<compile_context>
chip_gen: v7x
topology: tpu7x:2x2x1
jax: 0.10.0
libtpu: 0.0.40
codegen_flags: <defaults>
</compile_context>

<pallas_src>
import functools

import jax
import jax.numpy as jnp
from jax.experimental import pallas as pl
from jax.experimental.pallas import tpu as pltpu

LN_EPS = 1e-6
_MIB = 1 << 20


def _round_up(x: int, m: int) -> int:
    return ((x + m - 1) // m) * m


# ---------------------------------------------------------------------------
# Generation-aware tiling config.
#   vmem_budget : target working-set size used when picking tm/tf
#   vmem_cap    : ceiling for the scoped-VMEM request (Mosaic needs headroom)
#   cores       : TensorCores per chip (v7x = 2 -> keep multiple row tiles)
#   tm_*        : row-tile targets past the compute-bound threshold per dtype
# ---------------------------------------------------------------------------
_GEN_CFG = {
    "v5e": dict(vmem_budget=96 * _MIB, vmem_cap=112 * _MIB, cores=1, tm_bf16=512, tm_f32=1024),
    "v5p": dict(vmem_budget=96 * _MIB, vmem_cap=112 * _MIB, cores=1, tm_bf16=1024, tm_f32=1024),
    "v6e": dict(vmem_budget=96 * _MIB, vmem_cap=112 * _MIB, cores=1, tm_bf16=1024, tm_f32=2048),
    "v7x": dict(vmem_budget=48 * _MIB, vmem_cap=56 * _MIB, cores=2, tm_bf16=1024, tm_f32=1024),
}
# Unknown hardware: stay conservative (fits a 64 MiB-VMEM part).
_GEN_DEFAULT = dict(vmem_budget=48 * _MIB, vmem_cap=56 * _MIB, cores=1, tm_bf16=512, tm_f32=1024)


def _tpu_config():
    try:
        kind = jax.devices()[0].device_kind.lower()
    except Exception:
        return _GEN_DEFAULT
    if "v7" in kind:
        return _GEN_CFG["v7x"]
    if "v6" in kind:
        return _GEN_CFG["v6e"]
    if "v5p" in kind:
        return _GEN_CFG["v5p"]
    if "v5" in kind:
        return _GEN_CFG["v5e"]
    return _GEN_DEFAULT


def t5_adapt_kernel(x_ref, ln_w_ref, wi_ref, wo_ref, o_ref, norm_ref, acc_ref,
                    *, d_actual: int):
    # grid = (row tiles, d_ff tiles); the d_ff axis is a reduction ("arbitrary").
    f = pl.program_id(1)

    @pl.when(f == 0)
    def _init():
        x_f32 = x_ref[...].astype(jnp.float32)
        # T5LayerNorm: RMS statistics in fp32 over the *unpadded* feature dim.
        var = jnp.sum(x_f32 * x_f32, axis=-1, keepdims=True) * (1.0 / d_actual)
        norm = x_f32 * jax.lax.rsqrt(var + LN_EPS)
        # Cast back to the weight dtype before scaling / matmul (torch semantics:
        # a bf16 model runs the MLP matmuls on bf16 operands -> MXU-friendly).
        norm_ref[...] = (norm.astype(norm_ref.dtype)
                         * ln_w_ref[...].astype(norm_ref.dtype))
        # Residual is pre-loaded into the fp32 accumulator so the finalize step
        # is a pure cast (no extra add / zero-fill per row tile).
        acc_ref[...] = x_f32

    # wi -> ReLU -> (dropout = identity) -> wo, accumulated over d_ff tiles.
    # The first matmul emits directly in the weight dtype (bf16 on bf16 models):
    # the MXU still accumulates internally in fp32, and the tm x tf intermediate
    # costs half the VMEM traffic with no extra cast pass.
    h = jnp.dot(norm_ref[...], wi_ref[...], preferred_element_type=wo_ref.dtype)
    h = jnp.maximum(h, 0)
    acc_ref[...] += jnp.dot(h, wo_ref[...], preferred_element_type=jnp.float32)

    @pl.when(f == pl.num_programs(1) - 1)
    def _finalize():
        o_ref[...] = acc_ref[...].astype(o_ref.dtype)


def t5_layer_adapt(hidden_states, ln_weight, wi, wo, *, tm=None, tf=None):
    """hidden_states: [B, S, D]; ln_weight: [D]; wi: [D, F] (= torch wi.weight.T);
    wo: [F, D] (= torch wo.weight.T)."""
    B, S, D = hidden_states.shape
    Dw, F = wi.shape
    assert Dw == D and wo.shape == (F, D) and ln_weight.shape == (D,)
    N = B * S

    cfg = _tpu_config()
    x_bytes = jnp.dtype(hidden_states.dtype).itemsize
    w_bytes = jnp.dtype(wi.dtype).itemsize

    # Lane-dense padding targets: last dims of every block must be multiples of 128.
    D_pad = _round_up(D, 128)
    F_pad = _round_up(F, 128)

    # ---- row tile: dtype- and generation-dependent (arithmetic-intensity lever) ----
    if tm is None:
        tm = cfg["tm_bf16"] if x_bytes <= 2 else cfg["tm_f32"]
    tm = max(8, min(_round_up(tm, 8), _round_up(N, 8)))
    if cfg["cores"] > 1 and N > 8:
        # Keep at least 2*cores row tiles so the "parallel" row axis can shard
        # across the TensorCores (v7x megacore) instead of idling one core.
        tm = min(tm, max(8, _round_up(pl.cdiv(N, 2 * cfg["cores"]), 8)))

    # ---- d_ff tile: full d_ff if the VMEM budget allows, else shrink ----
    if tf is None:
        tf = F_pad
    tf = _round_up(min(tf, F_pad), 128)

    def vmem_use(tm_, tf_):
        return (2 * tm_ * D_pad * x_bytes        # x tiles (double-buffered)
                + 2 * tm_ * D_pad * x_bytes      # out tiles
                + 2 * D_pad * tf_ * w_bytes      # wi slices (double-buffered)
                + 2 * tf_ * D_pad * w_bytes      # wo slices
                + 2 * D_pad * w_bytes            # layer-norm weight
                + tm_ * D_pad * w_bytes          # normalized-activation scratch
                + tm_ * D_pad * 4                # fp32 accumulator
                + tm_ * tf_ * w_bytes)           # ReLU intermediate

    while vmem_use(tm, tf) > cfg["vmem_budget"] and tf > 512:
        tf = max(512, _round_up(tf // 2, 128))
    while vmem_use(tm, tf) > cfg["vmem_budget"] and tm > 128:
        tm = max(128, _round_up(tm // 2, 8))

    N_pad = _round_up(N, tm)
    F_pad = _round_up(F_pad, tf)

    # ---- pad only when needed (real T5 configs are already 128-aligned) ----
    x2d = hidden_states.reshape(N, D)
    if (N_pad, D_pad) != (N, D):
        x2d = jnp.pad(x2d, ((0, N_pad - N), (0, D_pad - D)))
    ln2d = ln_weight.reshape(1, D)
    if D_pad != D:
        ln2d = jnp.pad(ln2d, ((0, 0), (0, D_pad - D)))
    wi_p = wi if (D_pad, F_pad) == (D, F) else jnp.pad(wi, ((0, D_pad - D), (0, F_pad - F)))
    wo_p = wo if (F_pad, D_pad) == (F, D) else jnp.pad(wo, ((0, F_pad - F), (0, D_pad - D)))

    vmem_limit = min(cfg["vmem_cap"],
                     max(int(vmem_use(tm, tf) * 1.3) + (4 << 20), 32 * _MIB))

    num_row_tiles = N_pad // tm
    # Accurate traffic estimate: weights (and the tiny LN row) are re-streamed once
    # per row tile; activations are read once and written once.
    cost = pl.CostEstimate(
        flops=4 * N * D * F,
        transcendentals=N,
        bytes_accessed=2 * N_pad * D_pad * x_bytes
        + num_row_tiles * (wi_p.size + wo_p.size + ln2d.size) * w_bytes,
    )

    kernel = functools.partial(t5_adapt_kernel, d_actual=D)

    out2d = pl.pallas_call(
        kernel,
        out_shape=jax.ShapeDtypeStruct((N_pad, D_pad), hidden_states.dtype),
        grid=(num_row_tiles, F_pad // tf),
        in_specs=[
            pl.BlockSpec((tm, D_pad), lambda i, f: (i, 0)),    # x rows
            pl.BlockSpec((1, D_pad), lambda i, f: (0, 0)),     # layer-norm weight
            pl.BlockSpec((D_pad, tf), lambda i, f: (0, f)),    # wi slice
            pl.BlockSpec((tf, D_pad), lambda i, f: (f, 0)),    # wo slice
        ],
        out_specs=pl.BlockSpec((tm, D_pad), lambda i, f: (i, 0)),
        scratch_shapes=[
            pltpu.VMEM((tm, D_pad), wi_p.dtype),     # normalized activations
            pltpu.VMEM((tm, D_pad), jnp.float32),    # fp32 accumulator (holds residual)
        ],
        compiler_params=pltpu.CompilerParams(
            dimension_semantics=("parallel", "arbitrary"),
            vmem_limit_bytes=vmem_limit,
        ),
        cost_estimate=cost,
    )(x2d, ln2d, wi_p, wo_p)

    if (N_pad, D_pad) != (N, D):
        out2d = out2d[:N, :D]
    return out2d.reshape(B, S, D)


def t5_layer_adapt_ref(hidden_states, ln_weight, wi, wo):
    x = hidden_states.astype(jnp.float32)
    var = jnp.mean(x * x, axis=-1, keepdims=True)
    norm = ln_weight.astype(jnp.float32) * (x * jax.lax.rsqrt(var + LN_EPS))
    y = jnp.maximum(norm @ wi.astype(jnp.float32), 0.0) @ wo.astype(jnp.float32)
    return (x + y).astype(hidden_states.dtype)


if __name__ == "__main__":
    # config: d_model=32, d_ff=64; batch=2, seq=8 (toy shapes; padded to lane width internally)
    B, S, D, Fdim = 2, 8, 32, 64
    key = jax.random.PRNGKey(0)
    k_x, k_wi, k_wo = jax.random.split(key, 3)

    hidden_states = jax.random.normal(k_x, (B, S, D), dtype=jnp.float32)
    ln_weight = jnp.ones((D,), dtype=jnp.float32)            # nn.Parameter(torch.ones(D))
    # torch nn.Linear weights are [out, in]; we pass the [in, out] transposes.
    wi = jax.random.normal(k_wi, (D, Fdim), dtype=jnp.float32) * 0.05
    wo = jax.random.normal(k_wo, (Fdim, D), dtype=jnp.float32) * 0.05

    out = jax.block_until_ready(t5_layer_adapt(hidden_states, ln_weight, wi, wo))
    ref = t5_layer_adapt_ref(hidden_states, ln_weight, wi, wo)
    assert jnp.allclose(out, ref, atol=1e-5, rtol=1e-5), "fp32 mismatch vs reference"

    # bf16 path: matmul operands stay bf16 (MXU-friendly); the ReLU intermediate is
    # emitted in bf16 straight from the MXU (matches torch bf16 Linear semantics).
    hs_bf16 = hidden_states.astype(jnp.bfloat16)
    out_bf16 = jax.block_until_ready(
        t5_layer_adapt(hs_bf16, ln_weight.astype(jnp.bfloat16),
                       wi.astype(jnp.bfloat16), wo.astype(jnp.bfloat16)))
    ref_bf16 = t5_layer_adapt_ref(hs_bf16, ln_weight.astype(jnp.bfloat16),
                                  wi.astype(jnp.bfloat16), wo.astype(jnp.bfloat16))
    assert jnp.allclose(out_bf16.astype(jnp.float32), ref_bf16.astype(jnp.float32),
                        atol=1e-1, rtol=1e-1), "bf16 mismatch vs reference"

    # TODO(synk): dropout layers are treated as identity (inference / eval mode).
    print("KERNEL_OK")
</pallas_src>

<mosaic_0001>
module attributes {stable_mosaic.version = 11 : i64} {
  func.func @t5_adapt_kernel(%arg0: i32, %arg1: i32, %arg2: memref<16x128xf32, #tpu.memory_space<vmem>>, %arg3: memref<1x128xf32, #tpu.memory_space<vmem>>, %arg4: memref<128x128xf32, #tpu.memory_space<vmem>>, %arg5: memref<128x128xf32, #tpu.memory_space<vmem>>, %arg6: memref<16x128xf32, #tpu.memory_space<vmem>>, %arg7: memref<16x128xf32, #tpu.memory_space<vmem>>, %arg8: memref<16x128xf32, #tpu.memory_space<vmem>>) attributes {dimension_semantics = [#tpu.dimension_semantics<parallel>, #tpu.dimension_semantics<arbitrary>], iteration_bounds = array<i64: 1, 1>, scalar_prefetch = 0 : i64, scratch_operands = 2 : i64, tpu.core_type = #tpu.core_type<tc>, window_params = [{transform_indices = @transform_0, window_bounds = array<i64: 16, 128>}, {pipeline_mode = #tpu.pipeline_mode<synchronous>, transform_indices = @transform_1, window_bounds = array<i64: 1, 128>}, {transform_indices = @transform_2, window_bounds = array<i64: 128, 128>}, {transform_indices = @transform_3, window_bounds = array<i64: 128, 128>}, {transform_indices = @transform_4, window_bounds = array<i64: 16, 128>}]} {
    %c0_i32 = arith.constant 0 : i32
    %0 = arith.cmpi eq, %arg1, %c0_i32 : i32
    %1 = arith.extui %0 : i1 to i32
    %c0_i32_0 = arith.constant 0 : i32
    %2 = arith.cmpi ne, %1, %c0_i32_0 : i32
    scf.if %2 {
      %c0_14 = arith.constant 0 : index
      %c0_15 = arith.constant 0 : index
      %16 = vector.load %arg2[%c0_14, %c0_15] : memref<16x128xf32, #tpu.memory_space<vmem>>, vector<16x128xf32>
      %17 = arith.mulf %16, %16 : vector<16x128xf32>
      %cst_16 = arith.constant dense<0.000000e+00> : vector<16xf32>
      %18 = vector.multi_reduction <add>, %17, %cst_16 [1] : vector<16x128xf32> to vector<16xf32>
      %19 = vector.shape_cast %18 : vector<16xf32> to vector<16x1xf32>
      %cst_17 = arith.constant 3.125000e-02 : f32
      %20 = vector.broadcast %cst_17 : f32 to vector<16x1xf32>
      %21 = arith.mulf %19, %20 : vector<16x1xf32>
      %cst_18 = arith.constant 9.99999997E-7 : f32
      %22 = vector.broadcast %cst_18 : f32 to vector<16x1xf32>
      %23 = arith.addf %21, %22 : vector<16x1xf32>
      %24 = math.rsqrt %23 : vector<16x1xf32>
      %25 = vector.broadcast %24 : vector<16x1xf32> to vector<16x128xf32>
      %26 = arith.mulf %16, %25 : vector<16x128xf32>
      %c0_19 = arith.constant 0 : index
      %c0_20 = arith.constant 0 : index
      %27 = vector.load %arg3[%c0_19, %c0_20] : memref<1x128xf32, #tpu.memory_space<vmem>>, vector<1x128xf32>
      %28 = vector.broadcast %27 : vector<1x128xf32> to vector<16x128xf32>
      %29 = arith.mulf %26, %28 : vector<16x128xf32>
      %c0_21 = arith.constant 0 : index
      %c0_22 = arith.constant 0 : index
      %30 = vector.load %arg7[%c0_21, %c0_22] : memref<16x128xf32, #tpu.memory_space<vmem>>, vector<16x128xf32>
      tpu.vector_store %arg7[%c0_21, %c0_22], %29 {strides = array<i32>} : memref<16x128xf32, #tpu.memory_space<vmem>>, vector<16x128xf32>,
      %c0_23 = arith.constant 0 : index
      %c0_24 = arith.constant 0 : index
      %31 = vector.load %arg8[%c0_23, %c0_24] : memref<16x128xf32, #tpu.memory_space<vmem>>, vector<16x128xf32>
      tpu.vector_store %arg8[%c0_23, %c0_24], %16 {strides = array<i32>} : memref<16x128xf32, #tpu.memory_space<vmem>>, vector<16x128xf32>,
    } else {
    }
    %c0 = arith.constant 0 : index
    %c0_1 = arith.constant 0 : index
    %3 = vector.load %arg7[%c0, %c0_1] : memref<16x128xf32, #tpu.memory_space<vmem>>, vector<16x128xf32>
    %c0_2 = arith.constant 0 : index
    %c0_3 = arith.constant 0 : index
    %4 = vector.load %arg4[%c0_2, %c0_3] : memref<128x128xf32, #tpu.memory_space<vmem>>, vector<128x128xf32>
    %cst = arith.constant dense<0.000000e+00> : vector<16x128xf32>
    %5 = tpu.matmul %3, %4, %cst {dimension_numbers = #tpu.dot_dimension_numbers<[1], [0], [0], [1], [0, 0, 1, 1], [], []>} : vector<16x128xf32>, vector<128x128xf32>, vector<16x128xf32> -> vector<16x128xf32>
    %cst_4 = arith.constant 0.000000e+00 : f32
    %6 = vector.broadcast %cst_4 : f32 to vector<16x128xf32>
    %7 = arith.maximumf %5, %6 : vector<16x128xf32>
    %c0_5 = arith.constant 0 : index
    %c0_6 = arith.constant 0 : index
    %8 = vector.load %arg8[%c0_5, %c0_6] : memref<16x128xf32, #tpu.memory_space<vmem>>, vector<16x128xf32>
    %c0_7 = arith.constant 0 : index
    %c0_8 = arith.constant 0 : index
    %9 = vector.load %arg5[%c0_7, %c0_8] : memref<128x128xf32, #tpu.memory_space<vmem>>, vector<128x128xf32>
    %cst_9 = arith.constant dense<0.000000e+00> : vector<16x128xf32>
    %10 = tpu.matmul %7, %9, %cst_9 {dimension_numbers = #tpu.dot_dimension_numbers<[1], [0], [0], [1], [0, 0, 1, 1], [], []>} : vector<16x128xf32>, vector<128x128xf32>, vector<16x128xf32> -> vector<16x128xf32>
    %11 = arith.addf %8, %10 : vector<16x128xf32>
    %c0_10 = arith.constant 0 : index
    %c0_11 = arith.constant 0 : index
    %12 = vector.load %arg8[%c0_10, %c0_11] : memref<16x128xf32, #tpu.memory_space<vmem>>, vector<16x128xf32>
    tpu.vector_store %arg8[%c0_10, %c0_11], %11 {strides = array<i32>} : memref<16x128xf32, #tpu.memory_space<vmem>>, vector<16x128xf32>,
    %c0_i32_12 = arith.constant 0 : i32
    %13 = arith.cmpi eq, %arg1, %c0_i32_12 : i32
    %14 = arith.extui %13 : i1 to i32
    %c0_i32_13 = arith.constant 0 : i32
    %15 = arith.cmpi ne, %14, %c0_i32_13 : i32
    scf.if %15 {
      %c0_14 = arith.constant 0 : index
      %c0_15 = arith.constant 0 : index
      %16 = vector.load %arg8[%c0_14, %c0_15] : memref<16x128xf32, #tpu.memory_space<vmem>>, vector<16x128xf32>
      %c0_16 = arith.constant 0 : index
      %c0_17 = arith.constant 0 : index
      %17 = vector.load %arg6[%c0_16, %c0_17] : memref<16x128xf32, #tpu.memory_space<vmem>>, vector<16x128xf32>
      tpu.vector_store %arg6[%c0_16, %c0_17], %16 {strides = array<i32>} : memref<16x128xf32, #tpu.memory_space<vmem>>, vector<16x128xf32>,
    } else {
    }
    return
  }
  func.func @transform_0(%arg0: i32, %arg1: i32) -> (i32, i32) {
    %c0_i32 = arith.constant 0 : i32
    %c0_i32_0 = arith.constant 0 : i32
    return %arg0, %c0_i32 : i32, i32
  }
  func.func @transform_1(%arg0: i32, %arg1: i32) -> (i32, i32) {
    %c0_i32 = arith.constant 0 : i32
    %c0_i32_0 = arith.constant 0 : i32
    %c0_i32_1 = arith.constant 0 : i32
    return %c0_i32, %c0_i32_0 : i32, i32
  }
  func.func @transform_2(%arg0: i32, %arg1: i32) -> (i32, i32) {
    %c0_i32 = arith.constant 0 : i32
    %c0_i32_0 = arith.constant 0 : i32
    return %c0_i32, %arg1 : i32, i32
  }
  func.func @transform_3(%arg0: i32, %arg1: i32) -> (i32, i32) {
    %c0_i32 = arith.constant 0 : i32
    %c0_i32_0 = arith.constant 0 : i32
    return %arg1, %c0_i32 : i32, i32
  }
  func.func @transform_4(%arg0: i32, %arg1: i32) -> (i32, i32) {
    %c0_i32 = arith.constant 0 : i32
    %c0_i32_0 = arith.constant 0 : i32
    return %arg0, %c0_i32 : i32, i32
  }
}

</mosaic_0001>

<bundles_post_ra>
// kernel: tpu_custom_call.1
= control target key start
LH: loop header
LB: loop body
LE: loop exit
PB: predicated region body
PF: predicated region fallthrough
CT: control target
= control target key end

     0   :  { %9 = vsyncpa [#allocation5], 0  ;;  %s697_s0 = inlined_call_operand.hbm [shape: f32[16,128], index: 0, kind: input, shape index: {}]   ;;  %s698_s1 = inlined_call_operand.vmem [shape: f32[1,128], index: 1, kind: input, shape index: {}]   ;;  %s699_s2 = inlined_call_operand.hbm [shape: f32[128,128], index: 2, kind: input, shape index: {}]   ;;  %s700_s3 = inlined_call_operand.hbm [shape: f32[128,128], index: 3, kind: input, shape index: {}]   ;;  %s701_s4 = inlined_call_operand.hbm [shape: f32[16,128], index: 4, kind: output, shape index: {}]  }
   0x1   :  { %10 = vsyncpa [#allocation8], 0 }
   0x2   :  { %11 = vsyncpa [#allocation6], 0  ;;  %s584_s15 = smov [#allocation7]   ;;  %s585_s17 = smov [#allocation4]  }
   0x3   :  { %s31_s16 = sshll.u32 %s584_s15, 4  ;;  %s17_s18 = sshll.u32 %s585_s17, 4  ;;  %s32_s16 = int_to_ptr.vmem [resolvable:$true] %s31_s16  ;;  %s615_s18 = int_to_ptr.vmem [resolvable:$true] %s17_s18 }
   0x4   :  { %s490_s21 = scalar_lea.hbm %s699_s2, 2048 }
   0x5   :  { %p491_p0 = scmp.ne.s32.totalorder %s699_s2, %s490_s21  ;;  %p494_p1 = scmp.lt.u32.totalorder %s490_s21, %s699_s2 }
   0x7   :  { %p496_p2 = pnand %p494_p1, %p491_p0 }
   0x9   :  { %499 = shalt.err (!%p496_p2)
}
   0xa   :  { %s500_s26 = scalar_lea.vmem %s32_s16, 2048  ;;  %p505_p4 = scmp.lt.s32.totalorder %s32_s16, %s32_s16 }
   0xb   :  { %p501_p3 = scmp.ne.s32.totalorder %s32_s16, %s500_s26  ;;  %p506_p5 = scmp.lt.s32.totalorder %s500_s26, %s500_s26 }
   0xd   :  { %p507_p6 = por %p506_p5, %p505_p4 }
   0xf   :  { %p508_p7 = pnand %p507_p6, %p501_p3 }
  0x11   :  { %511 = shalt.err (!%p508_p7)
}
  0x12   :  { %s586_s27 = smov 128   ;;  %s587_s28 = smov 8  }
  0x13   :  { %37 = dma.hbm_to_vmem [thread:$0]  %s699_s2, 2048, %s32_s16, [#allocation8], %s586_s27, %s586_s27, %s587_s28  }
  0x14   :  { %s512_s7 = scalar_lea.hbm %s697_s0, 256 }
  0x15   :  { %p513_p8 = scmp.ne.s32.totalorder %s697_s0, %s512_s7  ;;  %p516_p9 = scmp.lt.u32.totalorder %s512_s7, %s697_s0 }
  0x17   :  { %p518_p10 = pnand %p516_p9, %p513_p8 }
  0x19   :  { %521 = shalt.err (!%p518_p10)
}
  0x1a   :  { %s522_s12 = scalar_lea.vmem %s615_s18, 256  ;;  %p527_p12 = scmp.lt.s32.totalorder %s615_s18, %s615_s18 }
  0x1b   :  { %p523_p11 = scmp.ne.s32.totalorder %s615_s18, %s522_s12  ;;  %p528_p13 = scmp.lt.s32.totalorder %s522_s12, %s522_s12 }
  0x1d   :  { %p529_p0 = por %p528_p13, %p527_p12 }
  0x1f   :  { %p530_p1 = pnand %p529_p0, %p523_p11 }
  0x21   :  { %533 = shalt.err (!%p530_p1)
}
  0x22   :  { %23 = dma.hbm_to_vmem [thread:$0]  %s697_s0, 256, %s615_s18, [#allocation5], %s586_s27, %s586_s27, %s587_s28  }
  0x23   :  { %s588_s14 = smov [#allocation9]   ;;  %s534_s19 = scalar_lea.hbm %s700_s3, 2048 }
  0x24   :  { %s43_s15 = sshll.u32 %s588_s14, 4  ;;  %p535_p2 = scmp.ne.s32.totalorder %s700_s3, %s534_s19  ;;  %s44_s15 = int_to_ptr.vmem [resolvable:$true] %s43_s15 }
  0x25   :  { %p538_p3 = scmp.lt.u32.totalorder %s534_s19, %s700_s3 }
  0x27   :  { %p540_p4 = pnand %p538_p3, %p535_p2 }
  0x29   :  { %543 = shalt.err (!%p540_p4)
}
  0x2a   :  { %s544_s24 = scalar_lea.vmem %s44_s15, 2048  ;;  %p549_p6 = scmp.lt.s32.totalorder %s44_s15, %s44_s15 }
  0x2b   :  { %p545_p5 = scmp.ne.s32.totalorder %s44_s15, %s544_s24  ;;  %p550_p7 = scmp.lt.s32.totalorder %s544_s24, %s544_s24 }
  0x2d   :  { %p551_p8 = por %p550_p7, %p549_p6 }
  0x2f   :  { %p552_p9 = pnand %p551_p8, %p545_p5 }
  0x31   :  { %555 = shalt.err (!%p552_p9)
}
  0x32   :  { %49 = dma.hbm_to_vmem [thread:$0]  %s700_s3, 2048, %s44_s15, [#allocation8], %s586_s27, %s586_s27, %s587_s28  }
  0x33   :  { %578 = dma.done.wait [#allocation5], 256  }
  0x34   :  { %579 = vsyncadd [#allocation5], 4294967040 }
  0x35   :  { %580 = dma.done.wait [#allocation8], 4096  }
  0x36   :  { %581 = vsyncadd [#allocation8], 4294963200  ;;  %v667_v0 = vld [vmem:[#allocation4] sm:$0xff]  ;;  %v669_v1 = vld [vmem:[#allocation4 + $0x8] sm:$0xff] }
  0x37   :  { %v94_v2 = vld [vmem:[#allocation7] sm:$0xff]  ;;  %v65_v3 = vmul.f32 %v667_v0, %v667_v0  ;;  %v95_v4 = vld [vmem:[#allocation7 + $0x8] sm:$0xff]  ;;  %v96_v5 = vld [vmem:[#allocation7 + $0x10] sm:$0xff]  ;;  %v66_v9 = vmul.f32 %v669_v1, %v669_v1 }
  0x38   :  { %v97_v6 = vld [vmem:[#allocation7 + $0x18] sm:$0xff]  ;;  %v416_v7 = vpack.c.bf16 %v95_v4, %v94_v2  ;;  %v98_v10 = vld [vmem:[#allocation7 + $0x20] sm:$0xff]  ;;  %v99_v11 = vld [vmem:[#allocation7 + $0x28] sm:$0xff] }
  0x39   :  { %v420_v8 = vpack.c.bf16 %v97_v6, %v96_v5  ;;  %67 = vadd.xlane.f32.xlu0 %v65_v3  ;;  %v424_v12 = vpack.c.bf16 %v99_v11, %v98_v10  ;;  %v100_v13 = vld [vmem:[#allocation7 + $0x30] sm:$0xff]  ;;  %v101_v14 = vld [vmem:[#allocation7 + $0x38] sm:$0xff]  ;;  %v102_v16 = vld [vmem:[#allocation7 + $0x40] sm:$0xff] }
  0x3a   :  { %417 = vmatprep.subr.bf16.mxu0 %v416_v7  ;;  %v428_v15 = vpack.c.bf16 %v101_v14, %v100_v13  ;;  %v103_v17 = vld [vmem:[#allocation7 + $0x48] sm:$0xff]  ;;  %v104_v19 = vld [vmem:[#allocation7 + $0x50] sm:$0xff]  ;;  %v105_v20 = vld [vmem:[#allocation7 + $0x58] sm:$0xff] }
  0x3b   :  { %419 = vmatpush3.bf16.msra.mxu0 %v416_v7  ;;  %v432_v18 = vpack.c.bf16 %v103_v17, %v102_v16  ;;  %v106_v21 = vld [vmem:[#allocation7 + $0x60] sm:$0xff]  ;;  %v436_v22 = vpack.c.bf16 %v105_v20, %v104_v19  ;;  %v107_v23 = vld [vmem:[#allocation7 + $0x68] sm:$0xff]  ;;  %v108_v25 = vld [vmem:[#allocation7 + $0x70] sm:$0xff] }
  0x3c   :  { %421 = vmatprep.subr.bf16.mxu0 %v420_v8  ;;  %v440_v24 = vpack.c.bf16 %v107_v23, %v106_v21  ;;  %v109_v26 = vld [vmem:[#allocation7 + $0x78] sm:$0xff]  ;;  %v189_v28 = vld [vmem:[#allocation9] sm:$0xff]  ;;  %v190_v29 = vld [vmem:[#allocation9 + $0x8] sm:$0xff] }
  0x3d   :  { %69 = vadd.xlane.f32.xlu0 %v66_v9  ;;  %v444_v27 = vpack.c.bf16 %v109_v26, %v108_v25  ;;  %v191_v30 = vld [vmem:[#allocation9 + $0x10] sm:$0xff]  ;;  %v448_v31 = vpack.c.bf16 %v190_v29, %v189_v28  ;;  %v192_v32 = vld [vmem:[#allocation9 + $0x18] sm:$0xff]  ;;  %v193_v34 = vld [vmem:[#allocation9 + $0x20] sm:$0xff] }
  0x3e   :  { %v452_v33 = vpack.c.bf16 %v192_v32, %v191_v30  ;;  %v194_v35 = vld [vmem:[#allocation9 + $0x28] sm:$0xff]  ;;  %v195_v37 = vld [vmem:[#allocation9 + $0x30] sm:$0xff]  ;;  %v196_v38 = vld [vmem:[#allocation9 + $0x38] sm:$0xff] }
  0x3f   :  { %423 = vmatpush3.bf16.msra.mxu0 %v420_v8  ;;  %449 = vmatprep.subr.bf16.mxu1 %v448_v31  ;;  %v456_v36 = vpack.c.bf16 %v194_v35, %v193_v34  ;;  %v460_v39 = vpack.c.bf16 %v196_v38, %v195_v37  ;;  %v197_v40 = vld [vmem:[#allocation9 + $0x40] sm:$0xff]  ;;  %v198_v41 = vld [vmem:[#allocation9 + $0x48] sm:$0xff]  ;;  %v199_v43 = vld [vmem:[#allocation9 + $0x50] sm:$0xff] }
  0x40   :  { %425 = vmatprep.subr.bf16.mxu0 %v424_v12  ;;  %451 = vmatpush3.bf16.msra.mxu1 %v448_v31  ;;  %v464_v42 = vpack.c.bf16 %v198_v41, %v197_v40  ;;  %v200_v44 = vld [vmem:[#allocation9 + $0x58] sm:$0xff]  ;;  %v201_v46 = vld [vmem:[#allocation9 + $0x60] sm:$0xff]  ;;  %v202_v47 = vld [vmem:[#allocation9 + $0x68] sm:$0xff] }
  0x41   :  { %453 = vmatprep.subr.bf16.mxu1 %v452_v33  ;;  %v468_v45 = vpack.c.bf16 %v200_v44, %v199_v43  ;;  %v472_v48 = vpack.c.bf16 %v202_v47, %v201_v46  ;;  %v309_v56 = vld [vmem:[%s698_s1] ss:$0 sm:$0xff]  ;;  %v204_v63 = vld [vmem:[#allocation9 + $0x78] sm:$0xff]  ;;  %s589_s1 = smov [#allocation10]  }
  0x42   :  { %v203_v62 = vld [vmem:[#allocation9 + $0x70] sm:$0xff]  ;;  %s296_s26 = sshll.u32 %s589_s1, 4  ;;  %s297_s26 = int_to_ptr.vmem [resolvable:$true] %s296_s26 }
  0x43   :  { %427 = vmatpush3.bf16.msra.mxu0 %v424_v12  ;;  %v476_v2 = vpack.c.bf16 %v204_v63, %v203_v62  ;;  %s556_s29 = scalar_lea.vmem %s297_s26, 256  ;;  %p561_p11 = scmp.lt.s32.totalorder %s297_s26, %s297_s26 }
  0x44   :  { %429 = vmatprep.subr.bf16.mxu0 %v428_v15  ;;  %455 = vmatpush3.bf16.msra.mxu1 %v452_v33  ;;  %p557_p10 = scmp.ne.s32.totalorder %s297_s26, %s556_s29  ;;  %p562_p12 = scmp.lt.s32.totalorder %s556_s29, %s556_s29 }
  0x45   :  { %457 = vmatprep.subr.bf16.mxu1 %v456_v36 }
  0x46   :  { %p563_p13 = por %p562_p12, %p561_p11 }
  0x47   :  { %431 = vmatpush3.bf16.msra.mxu0 %v428_v15 }
  0x48   :  { %433 = vmatprep.subr.bf16.mxu0 %v432_v18  ;;  %459 = vmatpush3.bf16.msra.mxu1 %v456_v36  ;;  %p564_p0 = pnand %p563_p13, %p557_p10 }
  0x49   :  { %461 = vmatprep.subr.bf16.mxu1 %v460_v39 }
  0x4b   :  { %435 = vmatpush3.bf16.msra.mxu0 %v432_v18 }
  0x4c   :  { %437 = vmatprep.subr.bf16.mxu0 %v436_v22  ;;  %463 = vmatpush3.bf16.msra.mxu1 %v460_v39 }
  0x4d   :  { %465 = vmatprep.subr.bf16.mxu1 %v464_v42 }
  0x4f   :  { %439 = vmatpush3.bf16.msra.mxu0 %v436_v22 }
  0x50   :  { %441 = vmatprep.subr.bf16.mxu0 %v440_v24  ;;  %467 = vmatpush3.bf16.msra.mxu1 %v464_v42 }
  0x51   :  { %469 = vmatprep.subr.bf16.mxu1 %v468_v45 }
  0x53   :  { %443 = vmatpush3.bf16.msra.mxu0 %v440_v24 }
  0x54   :  { %445 = vmatprep.subr.bf16.mxu0 %v444_v27  ;;  %471 = vmatpush3.bf16.msra.mxu1 %v468_v45 }
  0x55   :  { %473 = vmatprep.subr.bf16.mxu1 %v472_v48 }
  0x57   :  { %447 = vmatpush3.bf16.msra.mxu0 %v444_v27 }
  0x58   :  { %475 = vmatpush3.bf16.msra.mxu1 %v472_v48 }
  0x59   :  { %477 = vmatprep.subr.bf16.mxu1 %v476_v2 }
  0x5c   :  { %479 = vmatpush3.bf16.msra.mxu1 %v476_v2 }
  0xc6   :  { %v68_v49 = vpop.xlane.xlu0 %67 }
  0xc7   :  { %v71_v50 = vmul.f32 0.03125, %v68_v49 }
  0xc9   :  { %v73_v51 = vadd.f32 1e-06, %v71_v50 }
  0xca   :  { %v70_v52 = vpop.xlane.xlu0 %69 }
  0xcb   :  { %486 = vrsqrt.f32 %v73_v51  ;;  %v72_v53 = vmul.f32 0.03125, %v70_v52 }
  0xcd   :  { %v74_v54 = vadd.f32 1e-06, %v72_v53 }
  0xcf   :  { %488 = vrsqrt.f32 %v74_v54 }
  0xd5   :  { %v487_v55 = vpop.eup %486 }
  0xd6   :  { %v77_v57 = vmul.f32 %v487_v55, %v667_v0 }
  0xd8   :  { %v86_v58 = vmul.f32 %v309_v56, %v77_v57 }
  0xd9   :  { %v489_v59 = vpop.eup %488 }
  0xda   :  { %v78_v60 = vmul.f32 %v489_v59, %v669_v1  ;;  %378 = vmatprep.mubr.f32.mxu0 %v86_v58 }
  0xdc   :  { %v87_v61 = vmul.f32 %v309_v56, %v78_v60 }
  0xde   :  { %379 = vmatmul.mubr.f32.vlgmr.msra.gmra.mrb[0].mxu0 %v87_v61 }
 0x1b1   :  { %v380_v3 = vpop.f32.mrb[0].mxu0 }
 0x1b2   :  { %v176_v4 = vpop.f32.mrb[1].mxu0  ;;  %v186_v6 = vmax.f32 %v380_v3, 0.0 }
 0x1b3   :  { %v185_v5 = vmax.f32 %v176_v4, 0.0 }
 0x1b5   :  { %413 = vmatprep.mubr.f32.mxu1 %v185_v5 }
 0x1b6   :  { %414 = vmatmul.mubr.f32.vlgmr.msra.gmra.mrb[0].mxu1 %v186_v6 }
 0x289   :  { %v415_v7 = vpop.f32.mrb[0].mxu1 }
 0x28a   :  { %v281_v8 = vadd.f32 %v415_v7, %v669_v1  ;;  %v271_v9 = vpop.f32.mrb[1].mxu1 }
 0x28b   :  { %v280_v10 = vadd.f32 %v271_v9, %v667_v0 }
 0x28c   :  { %290 = vst [vmem:[#allocation10 + $0x8] sm:$0xff] %v281_v8 }
 0x28d   :  { %289 = vst [vmem:[#allocation10] sm:$0xff] %v280_v10 }
 0x28e   :  { %567 = shalt.err (!%p564_p0)
}
 0x28f   :  { %s568_s6 = scalar_lea.hbm %s701_s4, 256 }
 0x290   :  { %p569_p1 = scmp.ne.s32.totalorder %s701_s4, %s568_s6  ;;  %p572_p2 = scmp.lt.u32.totalorder %s568_s6, %s701_s4 }
 0x292   :  { %p574_p3 = pnand %p572_p2, %p569_p1 }
 0x294   :  { %577 = shalt.err (!%p574_p3)
}
 0x295   :  { %302 = dma.vmem_to_hbm [thread:$0]  %s297_s26, 256, %s701_s4, [#allocation6], %s586_s27, %s586_s27, %s587_s28  }
 0x296   :  { %582 = dma.done.wait [#allocation6], 256  }
 0x297   :  { %583 = vsyncadd [#allocation6], 4294967040 }
 0x298   :  { %306 = vsyncpa [#allocation5], 1 }
 0x299   :  { %307 = vsyncpa [#allocation8], 1 }
 0x29a   :  { %308 = vsyncpa [#allocation6], 1 }

</bundles_post_ra>
